<compile_context>
chip_gen: v5e
topology: v5e:2x2
jax: 0.10.0
libtpu: 0.0.40
codegen_flags: <defaults>
</compile_context>

<pallas_src>
import functools
import math

import jax
import jax.numpy as jnp
from jax.experimental import pallas as pl
from jax.experimental.pallas import tpu as pltpu


def _grm_kernel(n_ref, packed_ref, tg_ref, wt_ref, out_ref):
    """One tile of the graded-response log-likelihood.

    n_ref      : (1,) int32 SMEM        true (unpadded) row count N
    packed_ref : (1, TILE_N) int32      item << 16 | response(1..K)
    tg_ref     : (1, TILE_N) float32    pre-gathered person ability t[person]
    wt_ref     : (K1+1, n_items) f32    fused [a | b].T gather matrix (resident)
    out_ref    : (1, 1, 1) float32      partial sum of log-likelihood, this tile
    """
    k1p1, n_items = wt_ref.shape
    K1 = k1p1 - 1
    tile_n = packed_ref.shape[1]

    packed = packed_ref[...]                                      # (1, TILE_N) int32
    item = jnp.right_shift(packed, 16)                            # (1, TILE_N)
    resp = jnp.bitwise_and(packed, 0xFFFF)                        # (1, TILE_N), 1..K

    # --- in-kernel validity mask from scalar-prefetched N ---
    lane = jax.lax.broadcasted_iota(jnp.int32, (1, tile_n), 1)
    pos = pl.program_id(0) * tile_n + lane
    valid = (pos < n_ref[0]).astype(jnp.float32)                  # (1, TILE_N)

    # --- item gather on the MXU: one-hot (n_items, TILE_N) x fused [a|b] ---
    item_iota = jax.lax.broadcasted_iota(jnp.int32, (n_items, tile_n), 0)
    item_oh = (item_iota == item).astype(jnp.float32)

    gathered = jnp.dot(wt_ref[...], item_oh,
                       preferred_element_type=jnp.float32)        # (K1+1, TILE_N)
    a_g = gathered[0:1, :]                                        # (1,  TILE_N)
    b_g = gathered[1:, :]                                         # (K1, TILE_N)

    t_g = tg_ref[...]                                             # (1, TILE_N)

    # --- graded response probability, fused lower/upper selection ---
    p_star = jax.nn.sigmoid(a_g * (t_g - b_g))                    # (K1, TILE_N)

    g = jax.lax.broadcasted_iota(jnp.int32, (K1, tile_n), 0)
    # P(resp=r) = P*_{r-1} - P*_r with P*_0 = 1 and P*_K = 0:
    #   sel picks +p_star[r-2] and -p_star[r-1] (both naturally vanish when
    #   out of range, i.e. r == 1 or r == K), plus +1 when r == 1.
    sel = ((g == resp - 2).astype(jnp.float32)
           - (g == resp - 1).astype(jnp.float32))
    prob = (jnp.sum(p_star * sel, axis=0, keepdims=True)
            + (resp == 1).astype(jnp.float32))                    # (1, TILE_N)

    # TODO(synk): clamp replaces -inf for impossible/underflowed categories
    # (the torch reference would produce -inf there); it also keeps padded
    # lanes finite so the masked multiply below never yields NaN.
    log_p = jnp.log(jnp.maximum(prob, 1e-12))
    partial = jnp.sum(valid * log_p)
    out_ref[...] = jnp.full((1, 1, 1), partial, dtype=jnp.float32)


@functools.partial(jax.jit, static_argnames=("n_responses", "tile_n"))
def grm_forward(indices, a_, b_base_, b_diff_, t, *, n_responses, tile_n=8192):
    """Negative log posterior for a minibatch of (item, person, response) rows."""
    n_items = a_.shape[0]
    n_grades = b_diff_.shape[1] + 2
    K1 = n_grades - 1

    # ---- parameter transforms (cheap glue, plain JAX) ----
    a = jax.nn.softplus(a_).astype(jnp.float32)                        # (n_items,)
    b = jnp.cumsum(
        jnp.concatenate([b_base_, jax.nn.softplus(b_diff_)], axis=1),
        axis=1).astype(jnp.float32)                                    # (n_items, K1)
    t32 = t.astype(jnp.float32)                                        # (n_persons,)

    # Fused gather matrix [a | b], transposed for the lane-dense MXU matmul.
    # Kept in f32: the matmul is tiny (K1+1 x n_items) and bf16 would quantize
    # discriminations/thresholds to ~8 mantissa bits.
    wt = jnp.concatenate([a[:, None], b], axis=1).T.astype(jnp.float32)  # (K1+1, n_items)

    idx = indices.astype(jnp.int32)
    N = idx.shape[0]
    item = idx[:, 0]
    person = idx[:, 1]
    resp = idx[:, 2]

    # Pre-gather person ability (removes the O(N * n_persons) one-hot).
    t_g = jnp.take(t32, person, axis=0)                                # (N,)

    # ---- lane-dense layout + padding to a multiple of the tile size ----
    if N < tile_n:
        tile = max(128, -(-N // 128) * 128)
    else:
        tile = tile_n
    n_pad = -(-N // tile) * tile
    pad = n_pad - N
    grid_n = n_pad // tile

    # Pack item+resp into one int32 word; pad with (item=0, resp=1) so padded
    # lanes stay finite (they are masked out inside the kernel anyway).
    packed = item * 65536 + resp                                       # (N,) int32
    packed_p = jnp.pad(packed, (0, pad), constant_values=1).reshape(1, n_pad)
    tg_p = jnp.pad(t_g, (0, pad)).reshape(1, n_pad)                    # (1, n_pad) f32
    n_arr = jnp.array([N], jnp.int32)                                  # scalar prefetch

    cost = pl.CostEstimate(
        flops=2 * (K1 + 1) * n_items * n_pad + 12 * K1 * n_pad,
        transcendentals=(K1 + 1) * n_pad,
        bytes_accessed=8 * n_pad + 4 * grid_n,
    )

    partials = pl.pallas_call(
        _grm_kernel,
        out_shape=jax.ShapeDtypeStruct((grid_n, 1, 1), jnp.float32),
        grid_spec=pltpu.PrefetchScalarGridSpec(
            num_scalar_prefetch=1,
            grid=(grid_n,),
            in_specs=[
                pl.BlockSpec((1, tile), lambda i, n: (0, i)),          # packed item|resp
                pl.BlockSpec((1, tile), lambda i, n: (0, i)),          # t_g stream
                pl.BlockSpec((K1 + 1, n_items), lambda i, n: (0, 0)),  # resident [a|b].T
            ],
            out_specs=pl.BlockSpec((1, 1, 1), lambda i, n: (i, 0, 0)),
        ),
        compiler_params=pltpu.CompilerParams(
            dimension_semantics=("parallel",),   # lets v7x shard tiles across both TCs
            vmem_limit_bytes=32 * 1024 * 1024,   # safe on every generation (v7x: 64 MiB phys)
        ),
        cost_estimate=cost,
    )(n_arr, packed_p, tg_p, wt)

    log_lik = jnp.sum(partials)

    # ---- standard-normal log prior over a, b, t (batch independent, in JAX) ----
    c = 0.5 * math.log(2.0 * math.pi)
    log_prior = (jnp.sum(-0.5 * a * a - c)
                 + jnp.sum(-0.5 * b * b - c)
                 + jnp.sum(-0.5 * t32 * t32 - c))

    return -(log_lik + log_prior * (float(N) / float(n_responses)))


def _grm_reference(indices, a_, b_base_, b_diff_, t, *, n_responses):
    """Pure-JAX f32 reference of the same forward pass (for a sanity check)."""
    a = jax.nn.softplus(a_).astype(jnp.float32)
    b = jnp.cumsum(
        jnp.concatenate([b_base_, jax.nn.softplus(b_diff_)], axis=1),
        axis=1).astype(jnp.float32)
    t32 = t.astype(jnp.float32)
    item = indices[:, 0]
    person = indices[:, 1]
    resp = indices[:, 2]
    a_g = a[item]
    b_g = b[item]
    t_g = t32[person]
    p_star = jax.nn.sigmoid(a_g[:, None] * (t_g[:, None] - b_g))       # (N, K1)
    ones = jnp.ones((p_star.shape[0], 1), jnp.float32)
    zeros = jnp.zeros((p_star.shape[0], 1), jnp.float32)
    p_full = jnp.concatenate([ones, p_star, zeros], axis=1)            # (N, K1+2)
    p_lower = jnp.take_along_axis(p_full, (resp - 1)[:, None], axis=1)[:, 0]
    p_upper = jnp.take_along_axis(p_full, resp[:, None], axis=1)[:, 0]
    log_lik = jnp.sum(jnp.log(p_lower - p_upper))
    c = 0.5 * math.log(2.0 * math.pi)
    log_prior = (jnp.sum(-0.5 * a * a - c)
                 + jnp.sum(-0.5 * b * b - c)
                 + jnp.sum(-0.5 * t32 * t32 - c))
    return -(log_lik + log_prior * (indices.shape[0] / n_responses))


if __name__ == "__main__":
    key = jax.random.PRNGKey(0)
    n_items, n_persons, n_grades = 6, 10, 4
    n_total = 40  # total rows in the synthetic "response_array"

    k1, k2, k3, k4, k5, k6, k7 = jax.random.split(key, 7)
    items = jax.random.randint(k1, (n_total,), 0, n_items)
    persons = jax.random.randint(k2, (n_total,), 0, n_persons)
    resps = jax.random.randint(k3, (n_total,), 1, n_grades + 1)
    response_array = jnp.stack([items, persons, resps], axis=1).astype(jnp.int32)
    # make the column maxima match the intended sizes (as __init__ derives them)
    response_array = response_array.at[0].set(
        jnp.array([n_items - 1, n_persons - 1, n_grades], jnp.int32))

    # deterministic synthetic parameter init (shapes from the module's __init__)
    a_ = 0.1 * jax.random.normal(k4, (n_items,), jnp.float32)
    b_base_ = 0.1 * jax.random.normal(k5, (n_items, 1), jnp.float32)
    b_diff_ = 0.1 * jax.random.normal(k6, (n_items, n_grades - 2), jnp.float32)
    t = 0.1 * jax.random.normal(k7, (n_persons,), jnp.float32)

    # forward() takes a minibatch of index rows
    batch = response_array[:16]
    out = grm_forward(batch, a_, b_base_, b_diff_, t, n_responses=n_total)
    jax.block_until_ready(out)

    ref = _grm_reference(batch, a_, b_base_, b_diff_, t, n_responses=n_total)
    assert bool(jnp.isfinite(out))
    assert bool(jnp.allclose(out, ref, rtol=1e-3, atol=1e-2)), (out, ref)
    print("KERNEL_OK")
</pallas_src>

<mosaic_0001>
module attributes {stable_mosaic.version = 11 : i64} {
  func.func @_grm_kernel(%arg0: i32, %arg1: memref<1xi32, #tpu.memory_space<smem>>, %arg2: memref<1x128xi32, #tpu.memory_space<vmem>>, %arg3: memref<1x128xf32, #tpu.memory_space<vmem>>, %arg4: memref<4x6xf32, #tpu.memory_space<vmem>>, %arg5: memref<1x1x1xf32, #tpu.memory_space<vmem>>) attributes {dimension_semantics = [#tpu.dimension_semantics<parallel>], iteration_bounds = array<i64: 1>, scalar_prefetch = 1 : i64, scratch_operands = 0 : i64, tpu.core_type = #tpu.core_type<tc>, window_params = [{transform_indices = @transform_0, window_bounds = array<i64: 1, 128>}, {transform_indices = @transform_1, window_bounds = array<i64: 1, 128>}, {pipeline_mode = #tpu.pipeline_mode<synchronous>, transform_indices = @transform_2, window_bounds = array<i64: 4, 6>}, {transform_indices = @transform_3, window_bounds = array<i64: 1, 1, 1>}]} {
    %c0 = arith.constant 0 : index
    %c0_0 = arith.constant 0 : index
    %0 = vector.load %arg2[%c0, %c0_0] : memref<1x128xi32, #tpu.memory_space<vmem>>, vector<1x128xi32>
    %c16_i32 = arith.constant 16 : i32
    %1 = vector.broadcast %c16_i32 : i32 to vector<1x128xi32>
    %2 = arith.shrsi %0, %1 : vector<1x128xi32>
    %c65535_i32 = arith.constant 65535 : i32
    %3 = vector.broadcast %c65535_i32 : i32 to vector<1x128xi32>
    %4 = arith.andi %0, %3 : vector<1x128xi32>
    %5 = tpu.iota {dimensions = array<i32: 1>} : vector<1x128xi32>
    %c128_i32 = arith.constant 128 : i32
    %6 = arith.muli %arg0, %c128_i32 : i32
    %7 = vector.broadcast %6 : i32 to vector<1x128xi32>
    %8 = arith.addi %7, %5 : vector<1x128xi32>
    %c0_1 = arith.constant 0 : index
    %9 = memref.load %arg1[%c0_1] : memref<1xi32, #tpu.memory_space<smem>>
    %10 = vector.broadcast %9 : i32 to vector<1x128xi32>
    %11 = arith.cmpi slt, %8, %10 : vector<1x128xi32>
    %12 = arith.extui %11 : vector<1x128xi1> to vector<1x128xi32>
    %13 = arith.sitofp %12 : vector<1x128xi32> to vector<1x128xf32>
    %14 = tpu.iota {dimensions = array<i32: 0>} : vector<6x128xi32>
    %15 = vector.broadcast %2 : vector<1x128xi32> to vector<6x128xi32>
    %16 = arith.cmpi eq, %14, %15 : vector<6x128xi32>
    %17 = arith.extui %16 : vector<6x128xi1> to vector<6x128xi32>
    %18 = arith.sitofp %17 : vector<6x128xi32> to vector<6x128xf32>
    %c0_2 = arith.constant 0 : index
    %c0_3 = arith.constant 0 : index
    %19 = vector.load %arg4[%c0_2, %c0_3] : memref<4x6xf32, #tpu.memory_space<vmem>>, vector<4x6xf32>
    %cst = arith.constant dense<0.000000e+00> : vector<4x128xf32>
    %20 = tpu.matmul %19, %18, %cst {dimension_numbers = #tpu.dot_dimension_numbers<[1], [0], [0], [1], [0, 0, 1, 1], [], []>} : vector<4x6xf32>, vector<6x128xf32>, vector<4x128xf32> -> vector<4x128xf32>
    %21 = vector.extract_strided_slice %20 {offsets = [0, 0], sizes = [1, 128], strides = [1, 1]} : vector<4x128xf32> to vector<1x128xf32>
    %22 = vector.extract_strided_slice %20 {offsets = [1, 0], sizes = [3, 128], strides = [1, 1]} : vector<4x128xf32> to vector<3x128xf32>
    %c0_4 = arith.constant 0 : index
    %c0_5 = arith.constant 0 : index
    %23 = vector.load %arg3[%c0_4, %c0_5] : memref<1x128xf32, #tpu.memory_space<vmem>>, vector<1x128xf32>
    %24 = vector.broadcast %23 : vector<1x128xf32> to vector<3x128xf32>
    %25 = arith.subf %24, %22 : vector<3x128xf32>
    %26 = vector.broadcast %21 : vector<1x128xf32> to vector<3x128xf32>
    %27 = arith.mulf %26, %25 : vector<3x128xf32>
    %28 = arith.negf %27 : vector<3x128xf32>
    %29 = math.exp %28 : vector<3x128xf32>
    %cst_6 = arith.constant 1.000000e+00 : f32
    %30 = vector.broadcast %cst_6 : f32 to vector<3x128xf32>
    %31 = arith.addf %30, %29 : vector<3x128xf32>
    %32 = arith.divf %30, %31 : vector<3x128xf32>
    %33 = tpu.iota {dimensions = array<i32: 0>} : vector<3x128xi32>
    %c2_i32 = arith.constant 2 : i32
    %34 = vector.broadcast %c2_i32 : i32 to vector<1x128xi32>
    %35 = arith.subi %4, %34 : vector<1x128xi32>
    %36 = vector.broadcast %35 : vector<1x128xi32> to vector<3x128xi32>
    %37 = arith.cmpi eq, %33, %36 : vector<3x128xi32>
    %38 = arith.extui %37 : vector<3x128xi1> to vector<3x128xi32>
    %39 = arith.sitofp %38 : vector<3x128xi32> to vector<3x128xf32>
    %c1_i32 = arith.constant 1 : i32
    %40 = vector.broadcast %c1_i32 : i32 to vector<1x128xi32>
    %41 = arith.subi %4, %40 : vector<1x128xi32>
    %42 = vector.broadcast %41 : vector<1x128xi32> to vector<3x128xi32>
    %43 = arith.cmpi eq, %33, %42 : vector<3x128xi32>
    %44 = arith.extui %43 : vector<3x128xi1> to vector<3x128xi32>
    %45 = arith.sitofp %44 : vector<3x128xi32> to vector<3x128xf32>
    %46 = arith.subf %39, %45 : vector<3x128xf32>
    %47 = arith.mulf %32, %46 : vector<3x128xf32>
    %cst_7 = arith.constant dense<0.000000e+00> : vector<128xf32>
    %48 = vector.multi_reduction <add>, %47, %cst_7 [0] : vector<3x128xf32> to vector<128xf32>
    %49 = vector.shape_cast %48 : vector<128xf32> to vector<1x128xf32>
    %c1_i32_8 = arith.constant 1 : i32
    %50 = vector.broadcast %c1_i32_8 : i32 to vector<1x128xi32>
    %51 = arith.cmpi eq, %4, %50 : vector<1x128xi32>
    %52 = arith.extui %51 : vector<1x128xi1> to vector<1x128xi32>
    %53 = arith.sitofp %52 : vector<1x128xi32> to vector<1x128xf32>
    %54 = arith.addf %49, %53 : vector<1x128xf32>
    %cst_9 = arith.constant 9.99999996E-13 : f32
    %55 = vector.broadcast %cst_9 : f32 to vector<1x128xf32>
    %56 = arith.maximumf %54, %55 : vector<1x128xf32>
    %57 = math.log %56 : vector<1x128xf32>
    %58 = arith.mulf %13, %57 : vector<1x128xf32>
    %59 = vector.shape_cast %58 : vector<1x128xf32> to vector<1x1x128xf32>
    %cst_10 = arith.constant dense<0.000000e+00> : vector<1xf32>
    %60 = vector.multi_reduction <add>, %59, %cst_10 [1, 2] : vector<1x1x128xf32> to vector<1xf32>
    %61 = vector.shape_cast %60 : vector<1xf32> to vector<1x1x1xf32>
    %62 = vector.extract %61[0, 0, 0] : f32 from vector<1x1x1xf32>
    %63 = vector.broadcast %62 : f32 to vector<1x1x1xf32>
    %c0_11 = arith.constant 0 : index
    %c0_12 = arith.constant 0 : index
    %c0_13 = arith.constant 0 : index
    %64 = vector.load %arg5[%c0_11, %c0_12, %c0_13] : memref<1x1x1xf32, #tpu.memory_space<vmem>>, vector<1x1x1xf32>
    tpu.vector_store %arg5[%c0_11, %c0_12, %c0_13], %63 {strides = array<i32>} : memref<1x1x1xf32, #tpu.memory_space<vmem>>, vector<1x1x1xf32>,
    return
  }
  func.func @transform_0(%arg0: i32, %arg1: memref<1xi32, #tpu.memory_space<smem>>) -> (i32, i32) {
    %c0_i32 = arith.constant 0 : i32
    %c0_i32_0 = arith.constant 0 : i32
    return %c0_i32, %arg0 : i32, i32
  }
  func.func @transform_1(%arg0: i32, %arg1: memref<1xi32, #tpu.memory_space<smem>>) -> (i32, i32) {
    %c0_i32 = arith.constant 0 : i32
    %c0_i32_0 = arith.constant 0 : i32
    return %c0_i32, %arg0 : i32, i32
  }
  func.func @transform_2(%arg0: i32, %arg1: memref<1xi32, #tpu.memory_space<smem>>) -> (i32, i32) {
    %c0_i32 = arith.constant 0 : i32
    %c0_i32_0 = arith.constant 0 : i32
    %c0_i32_1 = arith.constant 0 : i32
    return %c0_i32, %c0_i32_0 : i32, i32
  }
  func.func @transform_3(%arg0: i32, %arg1: memref<1xi32, #tpu.memory_space<smem>>) -> (i32, i32, i32) {
    %c0_i32 = arith.constant 0 : i32
    %c0_i32_0 = arith.constant 0 : i32
    %c0_i32_1 = arith.constant 0 : i32
    return %arg0, %c0_i32, %c0_i32_0 : i32, i32, i32
  }
}

</mosaic_0001>

<bundles_post_ra>
// kernel: grm_forward.1
= control target key start
LH: loop header
LB: loop body
LE: loop exit
PB: predicated region body
PF: predicated region fallthrough
CT: control target
= control target key end

     0   :  { %v20_v1 = vlaneseq  ;;  %s244_s0 = inlined_call_operand.<no memory space> [shape: s32[1], index: 0, kind: input, shape index: {}]   ;;  %s245_s1 = inlined_call_operand.vmem [shape: s32[1,128], index: 1, kind: input, shape index: {}]   ;;  %s246_s2 = inlined_call_operand.vmem [shape: f32[1,128], index: 2, kind: input, shape index: {}]   ;;  %s247_s3 = inlined_call_operand.vmem [shape: f32[4,6], index: 3, kind: input, shape index: {}]   ;;  %s248_s4 = inlined_call_operand.hbm [shape: f32[1,1,1], index: 4, kind: output, shape index: {}]  }
   0x1   :  { %v17_v0 = vld [vmem:[%s245_s1] sm:$0x1] }
   0x2   :  { %v18_v2 = vshra.s32 %v17_v0, 16  ;;  %v19_v3 = vand.u32 65535, %v17_v0  ;;  %v31_v4 = vshrl.u32 %v20_v1, 7 }
   0x3   :  { %10 = vsyncpa [#allocation5], 0  ;;  %vm41_vm0 = vcmask 1045504   ;;  %v36_v10 = vld [vmem:[%s247_s3] sm:$0xf]  ;;  %vm37_vm2 = vcmask 48128   ;;  %v26_v48 = vstv %s244_s0 }
   0x4   :  { %v32_v5 = vperm.slane %v18_v2, 0  ;;  %v160_v6 = vadd.s32 4294967294, %v19_v3  ;;  %v162_v7 = vadd.s32 4294967295, %v19_v3  ;;  %v202_v11 = vmov 0.0   ;;  %v169_v16 = vld [vmem:[%s246_s2] ss:$0 sm:$0xff] }
   0x5   :  { %vm109_vm9 = vcmask 1042432   ;;  %vm117_vm10 = vcmp.eq.s32.totalorder %v19_v3, 1  ;;  %v21_v47 = vand.u32 127, %v20_v1  ;;  %vm125_vm12 = vcmask 1040384   ;;  %s203_s20 = smov [#allocation4]   ;;  %s146_s23 = sshll.u32 %s248_s4, 4  ;;  %s147_s23 = int_to_ptr.hbm [resolvable:$true] %s146_s23 }
   0x6   :  { %vm33_vm1 = vcmp.eq.s32.totalorder %v31_v4, %v32_v5  ;;  %v92_v8 = vperm.slane %v160_v6, 0  ;;  %v97_v9 = vperm.slane %v162_v7, 0  ;;  %v164_v43 = vsel %vm117_vm10, 1.0, %v202_v11  ;;  %s144_s21 = sshll.u32 %s203_s20, 4  ;;  %s145_s21 = int_to_ptr.vmem [resolvable:$true] %s144_s21 }
   0x7   :  { %v156_v12 = vsel %vm33_vm1, 1.0, %v202_v11  ;;  %vm27_vm11 = vcmp.lt.s32.totalorder %v21_v47, %v26_v48  ;;  %vm137_vm13 = vcmask 0  }
   0x8   :  { %157 = vmatpush.msk.msra.mxu0 %vm41_vm0, %v156_v12  ;;  %vm93_vm3 = vcmp.eq.s32.totalorder %v31_v4, %v92_v8  ;;  %vm98_vm4 = vcmp.eq.s32.totalorder %v31_v4, %v97_v9  ;;  %v155_v50 = vsel %vm27_vm11, 1.0, %v202_v11 }
   0x9   :  { %v161_v13 = vsel %vm93_vm3, 1.0, %v202_v11  ;;  %v163_v14 = vsel %vm98_vm4, 1.0, %v202_v11  ;;  %158 = vmatmul.msk.f32.vlgmr.msra.gmra.mxu0 %vm37_vm2, %v36_v10 }
   0xa   :  { %v101_v15 = vsub.f32 %v161_v13, %v163_v14 }
   0xc   :  { %v103_v30 = vrot.slane %v101_v15, 7 }
  0x86   :  { %v62_v17 = vpop.f32.mrf.mxu0 }
  0x87   :  { %v69_v18 = vsub.f32 %v169_v16, %v62_v17  ;;  %v70_v19 = vperm.slane %v62_v17, 0 }
  0x89   :  { %v71_v20 = vmul.f32 %v70_v19, %v69_v18 }
  0x8b   :  { %v159_v21 = vmul.f32 -1.442695, %v71_v20 }
  0x8d   :  { %170 = vpow2.f32 %v159_v21 }
  0x93   :  { %v171_v22 = vpop.eup %170 }
  0x94   :  { %v75_v23 = vadd.f32 1.0, %v171_v22 }
  0x96   :  { %172 = vrcp.f32 %v75_v23  ;;  %v87_v27 = vand.u32 2147483648, %v75_v23  ;;  %v85_v29 = vand.u32 2147483647, %v75_v23  ;;  %vm81_vm6 = vweird.f32 %v75_v23 }
  0x98   :  { %v88_v32 = vor.u32 1.1754944e-38, %v87_v27  ;;  %vm86_vm8 = vcmp.eq.f32.partialorder %v85_v29, 8.507059e+37 }
  0x9c   :  { %v173_v24 = vpop.eup %172 }
  0x9d   :  { %v77_v25 = vmul.f32 %v173_v24, %v75_v23  ;;  %vm82_vm5 = vweird.f32 %v173_v24 }
  0x9e   :  { %vm83_vm7 = vmor %vm81_vm6, %vm82_vm5 }
  0x9f   :  { %v78_v26 = vsub.f32 1.0, %v77_v25 }
  0xa1   :  { %v79_v28 = vmul.f32 %v173_v24, %v78_v26 }
  0xa3   :  { %v80_v31 = vadd.f32 %v173_v24, %v79_v28 }
  0xa5   :  { %v84_v33 = vsel %vm83_vm7, %v173_v24, %v80_v31 }
  0xa6   :  { %v89_v34 = vsel %vm86_vm8, %v88_v32, %v84_v33 }
  0xa7   :  { %v105_v35 = vmul.f32 %v103_v30, %v89_v34 }
  0xa9   :  { %v107_v36 = vrot.slane %v105_v35, 1 }
  0xab   :  { %v110_v37 = vsel %vm109_vm9, %v107_v36, 0.0 }
  0xac   :  { %v111_v38 = vrot.slane %v110_v37, 4 }
  0xae   :  { %v112_v39 = vadd.f32 %v111_v38, %v110_v37 }
  0xb0   :  { %v113_v40 = vrot.slane %v112_v39, 2 }
  0xb2   :  { %v114_v41 = vadd.f32 %v113_v40, %v112_v39 }
  0xb4   :  { %v115_v42 = vrot.slane %v114_v41, 1 }
  0xb6   :  { %v116_v44 = vadd.f32 %v115_v42, %v114_v41 }
  0xb8   :  { %v120_v45 = vadd.f32 %v164_v43, %v116_v44 }
  0xba   :  { %v121_v46 = vmax.f32 %v120_v45, 1e-12 }
  0xbc   :  { %174 = vlog2.f32 %v121_v46 }
  0xc2   :  { %v175_v49 = vpop.eup %174 }
  0xc3   :  { %v123_v51 = vmul.f32 0.6931472, %v175_v49 }
  0xc5   :  { %v124_v52 = vmul.f32 %v155_v50, %v123_v51 }
  0xc7   :  { %v126_v53 = vsel %vm125_vm12, %v124_v52, 0.0 }
  0xc8   :  { %127 = vadd.xlane.f32.xlu0 %v126_v53 }
 0x13b   :  { %v128_v54 = vpop.xlane.xlu0 %127 }
 0x13c   :  { %v129_v55 = vrot.slane %v128_v54, 4 }
 0x13e   :  { %v130_v56 = vadd.f32 %v129_v55, %v128_v54 }
 0x140   :  { %v131_v57 = vrot.slane %v130_v56, 2 }
 0x142   :  { %v132_v58 = vadd.f32 %v131_v57, %v130_v56 }
 0x144   :  { %v133_v59 = vrot.slane %v132_v58, 1 }
 0x146   :  { %v134_v60 = vadd.f32 %v133_v59, %v132_v58 }
 0x148   :  { %165 = vpush %v134_v60 }
 0x179   :  { %s166_s24 = spop %165 }
 0x17a   :  { %v136_v61 = vstv %s166_s24 }
 0x17b   :  { %138 = vst.msk [vmem:[#allocation4] sm:$0x1] %vm137_vm13, %v136_v61 }
 0x17c   :  { %149 = dma.vmem_to_hbm [thread:$0]  %s145_s21, 16, %s147_s23, [#allocation5]  }
 0x17d   :  { %200 = dma.done.wait [#allocation5], 16  }
 0x17e   :  { %201 = vsyncadd [#allocation5], 4294967280 }
 0x17f   :  { %154 = vsyncpa [#allocation5], 1 }

</bundles_post_ra>
